<compile_context>
chip_gen: v5e
topology: v5e:2x2
jax: 0.10.0
libtpu: 0.0.40
codegen_flags: <defaults>
</compile_context>

<pallas_src>
import math
import jax
import jax.numpy as jnp
from jax.experimental import pallas as pl
from jax.experimental.pallas import tpu as pltpu


def _round_up(x, m):
    return (x + m - 1) // m * m


def _cdiv(a, b):
    return (a + b - 1) // b


def _vmem_capacity_bytes():
    try:
        return int(pltpu.get_tpu_info().vmem_capacity_bytes)
    except Exception:
        return 64 << 20  # conservative default == v7x per-core VMEM


# --------------------------------------------------------------------------- kernel

def _make_kernel(S, TS, ragged_s):
    def kernel(h_ref, m_ref, w1_ref, b1_ref, w2_ref, b2_ref,
               out_ref, sum_h_ref, sum_m_ref):
        s = pl.program_id(1)

        # ---- init pooling accumulators at the start of each S sweep ----
        @pl.when(s == 0)
        def _init():
            sum_h_ref[...] = jnp.zeros_like(sum_h_ref)
            sum_m_ref[...] = jnp.zeros_like(sum_m_ref)

        # ---- streamed masked-sum pooling (one upcast per tile, f32 accumulation) ----
        h = h_ref[...]                     # [TB, TS, H] native dtype
        m = m_ref[0]                       # [TB, TS]    float32
        if ragged_s:
            # Last S tile overhangs the (unpadded) sequence: zero the out-of-bounds
            # positions in-kernel instead of materializing a padded HBM copy.
            pos = s * TS + jax.lax.broadcasted_iota(jnp.int32, m.shape, 1)
            valid = pos < S
            m = jnp.where(valid, m, 0.0)
            h = jnp.where(valid[:, :, None], h, jnp.zeros_like(h))

        hf = h.astype(jnp.float32)
        # TODO(synk): if the streaming sweep turns VALU-bound on v7x (3.2 TB/s HBM),
        #             offload this masked reduce to the MXU (batched dot) instead.
        sum_h_ref[...] += jnp.sum(hf * m[:, :, None], axis=1)      # [TB, H]
        sum_m_ref[...] += jnp.sum(m, axis=1, keepdims=True)        # [TB, 1]

        # ---- classifier tail: only on the last S step ----
        @pl.when(s == pl.num_programs(1) - 1)
        def _tail():
            denom = jnp.maximum(sum_m_ref[...], 1e-9)              # torch.clamp(min=1e-9)
            pooled = sum_h_ref[...] * pl.reciprocal(denom)         # exact recip (EUP)

            # (dropout is identity at inference)

            # Linear(H, H): weights pre-transposed to [in, out] -> no in-kernel .T
            x = jnp.dot(pooled.astype(w1_ref.dtype), w1_ref[...],
                        preferred_element_type=jnp.float32) + b1_ref[...]

            # LayerNorm(H) (PyTorch defaults: gamma=1, beta=0, eps=1e-5)
            mu = jnp.mean(x, axis=-1, keepdims=True)
            var = jnp.mean((x - mu) * (x - mu), axis=-1, keepdims=True)
            x = (x - mu) * jax.lax.rsqrt(var + 1e-5)

            # exact erf-GELU (matches nn.GELU default)
            x = 0.5 * x * (1.0 + jax.lax.erf(x * (1.0 / math.sqrt(2.0))))

            # Linear(H, CPAD): class dim padded to 128 lanes (padded cols are zeros)
            out_ref[...] = jnp.dot(x.astype(w2_ref.dtype), w2_ref[...],
                                   preferred_element_type=jnp.float32) + b2_ref[...]
    return kernel


# ------------------------------------------------------------------------- planning

def _plan_tiles(B, S, H, CPAD, h_itemsize, w_itemsize, vmem_cap):
    # TB: keep >= 2 B-tiles when the batch allows it (v7x megacore), cap at 128
    # (MXU M dim), never exceed B (so no block overhangs B unless B > TB).
    if B >= 16:
        TB = min(128, _round_up(_cdiv(B, 2), 8))
    else:
        TB = B
    TB = max(1, min(TB, B))

    usable = max(16 << 20, vmem_cap - (12 << 20))      # leave Mosaic headroom
    w_bytes = 2 * ((H * H + H * CPAD) * w_itemsize + (H + CPAD) * 4)

    def fixed(tb):
        # weights (x2 pipeline buffers), output tile x2, accumulators, misc
        return w_bytes + 2 * tb * CPAD * 4 + tb * (H + 128) * 4 + (2 << 20)

    def per_ts(tb):
        # hidden tile x2 buffers + ~3 f32 in-kernel temporaries + streamed mask x2
        return tb * (H * (2 * h_itemsize + 12) + 8)

    # shrink TB when even a minimal TS=8 hidden tile would not fit the budget
    while TB > 8 and fixed(TB) + 8 * per_ts(TB) > usable:
        TB = _round_up(TB // 2, 8)

    ts_budget = max(8, (usable - fixed(TB)) // per_ts(TB))
    if S <= ts_budget:
        TS = S                                          # single S step (block == full dim)
    else:
        TS = int(max(8, min(2048, (ts_budget // 8) * 8)))   # multiple of 8, ragged last tile
    return TB, TS, _cdiv(B, TB), _cdiv(S, TS)


# -------------------------------------------------------------------------- wrapper

def prepare_classifier_params(params):
    """Pre-transpose weights to [in, out] and pad the class dim to a lane-dense
    multiple of 128.  Call once and reuse across forward calls.  Weight matrices keep
    their native dtype (e.g. bf16) to halve HBM/VMEM traffic; biases are f32."""
    H = params["w1"].shape[0]
    C = params["w2"].shape[0]
    CPAD = _round_up(max(C, 128), 128)
    w1t = params["w1"].T                                                     # [H, H]
    b1 = params["b1"].reshape(1, H).astype(jnp.float32)                      # [1, H]
    w2t = jnp.zeros((H, CPAD), params["w2"].dtype).at[:, :C].set(params["w2"].T)
    b2 = jnp.zeros((1, CPAD), jnp.float32).at[:, :C].set(params["b2"].astype(jnp.float32))
    return {"w1t": w1t, "b1": b1, "w2t": w2t, "b2": b2, "num_classes": C}


def text_classifier_forward(hidden_states, attention_mask=None, params=None,
                            labels=None, prepared=None, tile_b=None, tile_s=None):
    """hidden_states: [B, S, H] (any float dtype), attention_mask: [B, S] or None."""
    B, S, H = hidden_states.shape
    if prepared is None:
        prepared = prepare_classifier_params(params)
    w1t, b1, w2t, b2 = prepared["w1t"], prepared["b1"], prepared["w2t"], prepared["b2"]
    C = prepared["num_classes"]
    CPAD = w2t.shape[1]

    if attention_mask is None:
        attention_mask = jnp.ones((B, S), jnp.float32)

    h_itemsize = jnp.dtype(hidden_states.dtype).itemsize
    w_itemsize = jnp.dtype(w1t.dtype).itemsize
    vmem_cap = _vmem_capacity_bytes()

    TB, TS, nb, ns = _plan_tiles(B, S, H, CPAD, h_itemsize, w_itemsize, vmem_cap)
    if tile_b is not None:                                # testing knobs
        TB = max(1, min(tile_b, B)); nb = _cdiv(B, TB)
    if tile_s is not None:
        TS = max(1, min(tile_s, S)); ns = _cdiv(S, TS)
    ragged_s = (S % TS) != 0

    # Attention mask: pad (cheap, only [B, S]) to the tile grid and reshape to
    # [ns, nb*TB, TS] so its streamed block is (1, TB, TS) with TS as the full last
    # dim -> no 128-lane constraint on TS, and hidden_states itself is never padded.
    Bm, Sm = nb * TB, ns * TS
    m_p = jnp.zeros((Bm, Sm), jnp.float32).at[:B, :S].set(attention_mask.astype(jnp.float32))
    m_r = m_p.reshape(Bm, ns, TS).transpose(1, 0, 2)      # [ns, Bm, TS]

    # ---- explicit VMEM budget, clamped to the physical capacity (v7x-safe) ----
    hid_tile = TB * TS * H * h_itemsize
    msk_tile = TB * TS * 4
    out_tile = TB * CPAD * 4
    w_bytes = (H * H + H * CPAD) * w_itemsize + (H + CPAD) * 4
    scr_bytes = TB * (H + 128) * 4
    temp_bytes = 3 * TB * TS * H * 4                      # in-kernel f32 intermediates
    vmem_limit = 2 * (hid_tile + msk_tile + out_tile + w_bytes) + scr_bytes + temp_bytes + (4 << 20)
    vmem_limit = int(max(32 << 20, vmem_limit))
    vmem_limit = int(min(vmem_limit, vmem_cap - (2 << 20)))

    grid_spec = pltpu.PrefetchScalarGridSpec(
        num_scalar_prefetch=0,
        grid=(nb, ns),
        in_specs=[
            pl.BlockSpec((TB, TS, H), lambda b, s: (b, s, 0)),   # hidden (streamed, unpadded)
            pl.BlockSpec((1, TB, TS), lambda b, s: (s, b, 0)),   # mask   (streamed, tiny)
            # TODO(synk): single-buffer these constant-index weights (pl.Buffered(1) or
            #             whole-array VMEM residency) once verified on the target JAX rev.
            pl.BlockSpec((H, H), lambda b, s: (0, 0)),           # W1^T  (resident)
            pl.BlockSpec((1, H), lambda b, s: (0, 0)),           # b1    (resident)
            pl.BlockSpec((H, CPAD), lambda b, s: (0, 0)),        # W2^T padded (resident)
            pl.BlockSpec((1, CPAD), lambda b, s: (0, 0)),        # b2 padded   (resident)
        ],
        out_specs=pl.BlockSpec((TB, CPAD), lambda b, s: (b, 0)), # lane-dense logits
        scratch_shapes=[pltpu.VMEM((TB, H), jnp.float32),        # sum_hidden accumulator
                        pltpu.VMEM((TB, 1), jnp.float32)],       # sum_mask accumulator
    )

    logits_pad = pl.pallas_call(
        _make_kernel(S, TS, ragged_s),
        out_shape=jax.ShapeDtypeStruct((B, CPAD), jnp.float32),
        grid_spec=grid_spec,
        compiler_params=pltpu.CompilerParams(
            dimension_semantics=("parallel", "arbitrary"),
            vmem_limit_bytes=vmem_limit),
    )(hidden_states, m_r, w1t, b1, w2t, b2)

    logits = logits_pad[:, :C]
    predictions = jnp.argmax(logits, axis=-1)
    probabilities = jax.nn.softmax(logits, axis=-1)       # tiny [B, C]: plain XLA is fine
    outputs = {"logits": logits, "predictions": predictions, "probabilities": probabilities}

    if labels is not None:
        # CrossEntropyLoss (mean reduction) on tiny [B, C] logits.
        logz = jax.nn.logsumexp(logits, axis=-1)
        picked = jnp.take_along_axis(logits, labels[:, None].astype(jnp.int32), axis=-1)[:, 0]
        outputs["loss"] = jnp.mean(logz - picked)
    return outputs


# ----------------------------------------------------------------- init & reference

def init_params(key, hidden_size, num_classes):
    """Matches TextClassifier.initialize(): Linear weights ~ N(0, 0.02), biases = 0.
    LayerNorm affine stays at PyTorch defaults (1, 0), folded into the kernel."""
    k1, k2 = jax.random.split(key)
    return {
        "w1": 0.02 * jax.random.normal(k1, (hidden_size, hidden_size), jnp.float32),  # [out,in]
        "b1": jnp.zeros((hidden_size,), jnp.float32),
        "w2": 0.02 * jax.random.normal(k2, (num_classes, hidden_size), jnp.float32),  # [out,in]
        "b2": jnp.zeros((num_classes,), jnp.float32),
    }


def _reference_logits(hidden_states, attention_mask, params):
    """Pure-JAX reference matching the PyTorch module (mean pooling, LN, erf-GELU)."""
    h = hidden_states.astype(jnp.float32)
    m = (jnp.ones(h.shape[:2], jnp.float32) if attention_mask is None
         else attention_mask.astype(jnp.float32))
    sum_h = jnp.sum(h * m[:, :, None], axis=1)
    sum_m = jnp.clip(jnp.sum(m, axis=1, keepdims=True), 1e-9, None)
    pooled = sum_h / sum_m
    x = pooled @ params["w1"].T.astype(jnp.float32) + params["b1"]
    mu = jnp.mean(x, axis=-1, keepdims=True)
    var = jnp.mean((x - mu) ** 2, axis=-1, keepdims=True)
    x = (x - mu) / jnp.sqrt(var + 1e-5)
    x = 0.5 * x * (1.0 + jax.lax.erf(x / math.sqrt(2.0)))
    return x @ params["w2"].T.astype(jnp.float32) + params["b2"]


if __name__ == "__main__":
    key = jax.random.PRNGKey(0)
    k1, k2, k3 = jax.random.split(key, 3)

    # --- case 1: tiny default shapes (single-tile path) ---
    B, S, H, C = 2, 8, 32, 2
    params = init_params(k1, H, C)
    prepared = prepare_classifier_params(params)          # prepared once, reused
    hidden_states = jax.random.normal(k2, (B, S, H), jnp.float32)
    attention_mask = jnp.array(
        [[1, 1, 1, 1, 1, 1, 1, 1],
         [1, 1, 1, 1, 1, 0, 0, 0]], jnp.float32)
    labels = jnp.array([0, 1], jnp.int32)

    out = text_classifier_forward(hidden_states, attention_mask, params,
                                  labels=labels, prepared=prepared)
    jax.block_until_ready(out)
    ref = _reference_logits(hidden_states, attention_mask, params)
    assert out["logits"].shape == (B, C)
    assert out["predictions"].shape == (B,)
    assert out["probabilities"].shape == (B, C)
    assert bool(jnp.all(jnp.isfinite(out["logits"])))
    assert bool(jnp.allclose(out["logits"], ref, atol=1e-4, rtol=1e-4))

    # --- case 2: ragged B and S tiles (multi-step streaming, no padded hidden copy) ---
    B2, S2, H2, C2 = 12, 20, 32, 3
    params2 = init_params(k3, H2, C2)
    hidden2 = jax.random.normal(jax.random.PRNGKey(7), (B2, S2, H2), jnp.float32)
    mask2 = (jax.random.uniform(jax.random.PRNGKey(11), (B2, S2)) > 0.25).astype(jnp.float32)
    out2 = text_classifier_forward(hidden2, mask2, params2, tile_b=8, tile_s=8)
    jax.block_until_ready(out2)
    ref2 = _reference_logits(hidden2, mask2, params2)
    assert bool(jnp.allclose(out2["logits"], ref2, atol=1e-4, rtol=1e-4))

    print("KERNEL_OK")
</pallas_src>

<mosaic_0001>
module attributes {stable_mosaic.version = 11 : i64} {
  func.func @kernel(%arg0: i32, %arg1: i32, %arg2: memref<2x8x32xf32, #tpu.memory_space<vmem>>, %arg3: memref<1x2x8xf32, #tpu.memory_space<vmem>>, %arg4: memref<32x32xf32, #tpu.memory_space<vmem>>, %arg5: memref<1x32xf32, #tpu.memory_space<vmem>>, %arg6: memref<32x128xf32, #tpu.memory_space<vmem>>, %arg7: memref<1x128xf32, #tpu.memory_space<vmem>>, %arg8: memref<2x128xf32, #tpu.memory_space<vmem>>, %arg9: memref<2x32xf32, #tpu.memory_space<vmem>>, %arg10: memref<2x1xf32, #tpu.memory_space<vmem>>) attributes {dimension_semantics = [#tpu.dimension_semantics<parallel>, #tpu.dimension_semantics<arbitrary>], iteration_bounds = array<i64: 1, 1>, scalar_prefetch = 0 : i64, scratch_operands = 2 : i64, tpu.core_type = #tpu.core_type<tc>, window_params = [{transform_indices = @transform_0, window_bounds = array<i64: 2, 8, 32>}, {transform_indices = @transform_1, window_bounds = array<i64: 1, 2, 8>}, {pipeline_mode = #tpu.pipeline_mode<synchronous>, transform_indices = @transform_2, window_bounds = array<i64: 32, 32>}, {pipeline_mode = #tpu.pipeline_mode<synchronous>, transform_indices = @transform_3, window_bounds = array<i64: 1, 32>}, {pipeline_mode = #tpu.pipeline_mode<synchronous>, transform_indices = @transform_4, window_bounds = array<i64: 32, 128>}, {pipeline_mode = #tpu.pipeline_mode<synchronous>, transform_indices = @transform_5, window_bounds = array<i64: 1, 128>}, {transform_indices = @transform_6, window_bounds = array<i64: 2, 128>}]} {
    %c0_i32 = arith.constant 0 : i32
    %0 = arith.cmpi eq, %arg1, %c0_i32 : i32
    %1 = arith.extui %0 : i1 to i32
    %c0_i32_0 = arith.constant 0 : i32
    %2 = arith.cmpi ne, %1, %c0_i32_0 : i32
    scf.if %2 {
      %cst_17 = arith.constant 0.000000e+00 : f32
      %21 = vector.broadcast %cst_17 : f32 to vector<2x32xf32>
      %c0_18 = arith.constant 0 : index
      %c0_19 = arith.constant 0 : index
      %22 = vector.load %arg9[%c0_18, %c0_19] : memref<2x32xf32, #tpu.memory_space<vmem>>, vector<2x32xf32>
      tpu.vector_store %arg9[%c0_18, %c0_19], %21 {strides = array<i32>} : memref<2x32xf32, #tpu.memory_space<vmem>>, vector<2x32xf32>,
      %cst_20 = arith.constant 0.000000e+00 : f32
      %23 = vector.broadcast %cst_20 : f32 to vector<2x1xf32>
      %c0_21 = arith.constant 0 : index
      %c0_22 = arith.constant 0 : index
      %24 = vector.load %arg10[%c0_21, %c0_22] : memref<2x1xf32, #tpu.memory_space<vmem>>, vector<2x1xf32>
      tpu.vector_store %arg10[%c0_21, %c0_22], %23 {strides = array<i32>} : memref<2x1xf32, #tpu.memory_space<vmem>>, vector<2x1xf32>,
    } else {
    }
    %c0 = arith.constant 0 : index
    %c0_1 = arith.constant 0 : index
    %c0_2 = arith.constant 0 : index
    %3 = vector.load %arg2[%c0, %c0_1, %c0_2] : memref<2x8x32xf32, #tpu.memory_space<vmem>>, vector<2x8x32xf32>
    %c0_3 = arith.constant 0 : index
    %c0_4 = arith.constant 0 : index
    %c0_5 = arith.constant 0 : index
    %4 = vector.load %arg3[%c0_3, %c0_4, %c0_5] : memref<1x2x8xf32, #tpu.memory_space<vmem>>, vector<1x2x8xf32>
    %5 = vector.shape_cast %4 : vector<1x2x8xf32> to vector<2x8xf32>
    %c0_6 = arith.constant 0 : index
    %c0_7 = arith.constant 0 : index
    %6 = vector.load %arg9[%c0_6, %c0_7] : memref<2x32xf32, #tpu.memory_space<vmem>>, vector<2x32xf32>
    %7 = vector.shape_cast %5 : vector<2x8xf32> to vector<2x8x1xf32>
    %8 = vector.broadcast %7 : vector<2x8x1xf32> to vector<2x8x32xf32>
    %9 = arith.mulf %3, %8 : vector<2x8x32xf32>
    %cst = arith.constant dense<0.000000e+00> : vector<2x32xf32>
    %10 = vector.multi_reduction <add>, %9, %cst [1] : vector<2x8x32xf32> to vector<2x32xf32>
    %11 = arith.addf %6, %10 : vector<2x32xf32>
    %c0_8 = arith.constant 0 : index
    %c0_9 = arith.constant 0 : index
    %12 = vector.load %arg9[%c0_8, %c0_9] : memref<2x32xf32, #tpu.memory_space<vmem>>, vector<2x32xf32>
    tpu.vector_store %arg9[%c0_8, %c0_9], %11 {strides = array<i32>} : memref<2x32xf32, #tpu.memory_space<vmem>>, vector<2x32xf32>,
    %c0_10 = arith.constant 0 : index
    %c0_11 = arith.constant 0 : index
    %13 = vector.load %arg10[%c0_10, %c0_11] : memref<2x1xf32, #tpu.memory_space<vmem>>, vector<2x1xf32>
    %cst_12 = arith.constant dense<0.000000e+00> : vector<2xf32>
    %14 = vector.multi_reduction <add>, %5, %cst_12 [1] : vector<2x8xf32> to vector<2xf32>
    %15 = vector.shape_cast %14 : vector<2xf32> to vector<2x1xf32>
    %16 = arith.addf %13, %15 : vector<2x1xf32>
    %c0_13 = arith.constant 0 : index
    %c0_14 = arith.constant 0 : index
    %17 = vector.load %arg10[%c0_13, %c0_14] : memref<2x1xf32, #tpu.memory_space<vmem>>, vector<2x1xf32>
    tpu.vector_store %arg10[%c0_13, %c0_14], %16 {strides = array<i32>} : memref<2x1xf32, #tpu.memory_space<vmem>>, vector<2x1xf32>,
    %c0_i32_15 = arith.constant 0 : i32
    %18 = arith.cmpi eq, %arg1, %c0_i32_15 : i32
    %19 = arith.extui %18 : i1 to i32
    %c0_i32_16 = arith.constant 0 : i32
    %20 = arith.cmpi ne, %19, %c0_i32_16 : i32
    scf.if %20 {
      %c0_17 = arith.constant 0 : index
      %c0_18 = arith.constant 0 : index
      %21 = vector.load %arg10[%c0_17, %c0_18] : memref<2x1xf32, #tpu.memory_space<vmem>>, vector<2x1xf32>
      %cst_19 = arith.constant 9.99999971E-10 : f32
      %22 = vector.broadcast %cst_19 : f32 to vector<2x1xf32>
      %23 = arith.maximumf %21, %22 : vector<2x1xf32>
      %c0_20 = arith.constant 0 : index
      %c0_21 = arith.constant 0 : index
      %24 = vector.load %arg9[%c0_20, %c0_21] : memref<2x32xf32, #tpu.memory_space<vmem>>, vector<2x32xf32>
      %25 = tpu.reciprocal %23 : vector<2x1xf32> -> vector<2x1xf32>
      %26 = vector.broadcast %25 : vector<2x1xf32> to vector<2x32xf32>
      %27 = arith.mulf %24, %26 : vector<2x32xf32>
      %c0_22 = arith.constant 0 : index
      %c0_23 = arith.constant 0 : index
      %28 = vector.load %arg4[%c0_22, %c0_23] : memref<32x32xf32, #tpu.memory_space<vmem>>, vector<32x32xf32>
      %cst_24 = arith.constant dense<0.000000e+00> : vector<2x32xf32>
      %29 = tpu.matmul %27, %28, %cst_24 {dimension_numbers = #tpu.dot_dimension_numbers<[1], [0], [0], [1], [0, 0, 1, 1], [], []>} : vector<2x32xf32>, vector<32x32xf32>, vector<2x32xf32> -> vector<2x32xf32>
      %c0_25 = arith.constant 0 : index
      %c0_26 = arith.constant 0 : index
      %30 = vector.load %arg5[%c0_25, %c0_26] : memref<1x32xf32, #tpu.memory_space<vmem>>, vector<1x32xf32>
      %31 = vector.broadcast %30 : vector<1x32xf32> to vector<2x32xf32>
      %32 = arith.addf %29, %31 : vector<2x32xf32>
      %cst_27 = arith.constant dense<0.000000e+00> : vector<2xf32>
      %33 = vector.multi_reduction <add>, %32, %cst_27 [1] : vector<2x32xf32> to vector<2xf32>
      %34 = vector.shape_cast %33 : vector<2xf32> to vector<2x1xf32>
      %cst_28 = arith.constant 3.200000e+01 : f32
      %35 = vector.broadcast %cst_28 : f32 to vector<2x1xf32>
      %36 = arith.divf %34, %35 : vector<2x1xf32>
      %37 = vector.broadcast %36 : vector<2x1xf32> to vector<2x32xf32>
      %38 = arith.subf %32, %37 : vector<2x32xf32>
      %39 = vector.broadcast %36 : vector<2x1xf32> to vector<2x32xf32>
      %40 = arith.subf %32, %39 : vector<2x32xf32>
      %41 = arith.mulf %38, %40 : vector<2x32xf32>
      %cst_29 = arith.constant dense<0.000000e+00> : vector<2xf32>
      %42 = vector.multi_reduction <add>, %41, %cst_29 [1] : vector<2x32xf32> to vector<2xf32>
      %43 = vector.shape_cast %42 : vector<2xf32> to vector<2x1xf32>
      %cst_30 = arith.constant 3.200000e+01 : f32
      %44 = vector.broadcast %cst_30 : f32 to vector<2x1xf32>
      %45 = arith.divf %43, %44 : vector<2x1xf32>
      %46 = vector.broadcast %36 : vector<2x1xf32> to vector<2x32xf32>
      %47 = arith.subf %32, %46 : vector<2x32xf32>
      %cst_31 = arith.constant 9.99999974E-6 : f32
      %48 = vector.broadcast %cst_31 : f32 to vector<2x1xf32>
      %49 = arith.addf %45, %48 : vector<2x1xf32>
      %50 = math.rsqrt %49 : vector<2x1xf32>
      %51 = vector.broadcast %50 : vector<2x1xf32> to vector<2x32xf32>
      %52 = arith.mulf %47, %51 : vector<2x32xf32>
      %cst_32 = arith.constant 5.000000e-01 : f32
      %53 = vector.broadcast %cst_32 : f32 to vector<2x32xf32>
      %54 = arith.mulf %53, %52 : vector<2x32xf32>
      %cst_33 = arith.constant 0.707106769 : f32
      %55 = vector.broadcast %cst_33 : f32 to vector<2x32xf32>
      %56 = arith.mulf %52, %55 : vector<2x32xf32>
      %57 = math.erf %56 : vector<2x32xf32>
      %cst_34 = arith.constant 1.000000e+00 : f32
      %58 = vector.broadcast %cst_34 : f32 to vector<2x32xf32>
      %59 = arith.addf %58, %57 : vector<2x32xf32>
      %60 = arith.mulf %54, %59 : vector<2x32xf32>
      %c0_35 = arith.constant 0 : index
      %c0_36 = arith.constant 0 : index
      %61 = vector.load %arg6[%c0_35, %c0_36] : memref<32x128xf32, #tpu.memory_space<vmem>>, vector<32x128xf32>
      %cst_37 = arith.constant dense<0.000000e+00> : vector<2x128xf32>
      %62 = tpu.matmul %60, %61, %cst_37 {dimension_numbers = #tpu.dot_dimension_numbers<[1], [0], [0], [1], [0, 0, 1, 1], [], []>} : vector<2x32xf32>, vector<32x128xf32>, vector<2x128xf32> -> vector<2x128xf32>
      %c0_38 = arith.constant 0 : index
      %c0_39 = arith.constant 0 : index
      %63 = vector.load %arg7[%c0_38, %c0_39] : memref<1x128xf32, #tpu.memory_space<vmem>>, vector<1x128xf32>
      %64 = vector.broadcast %63 : vector<1x128xf32> to vector<2x128xf32>
      %65 = arith.addf %62, %64 : vector<2x128xf32>
      %c0_40 = arith.constant 0 : index
      %c0_41 = arith.constant 0 : index
      %66 = vector.load %arg8[%c0_40, %c0_41] : memref<2x128xf32, #tpu.memory_space<vmem>>, vector<2x128xf32>
      tpu.vector_store %arg8[%c0_40, %c0_41], %65 {strides = array<i32>} : memref<2x128xf32, #tpu.memory_space<vmem>>, vector<2x128xf32>,
    } else {
    }
    return
  }
  func.func @transform_0(%arg0: i32, %arg1: i32) -> (i32, i32, i32) {
    %c0_i32 = arith.constant 0 : i32
    %c0_i32_0 = arith.constant 0 : i32
    return %arg0, %arg1, %c0_i32 : i32, i32, i32
  }
  func.func @transform_1(%arg0: i32, %arg1: i32) -> (i32, i32, i32) {
    %c0_i32 = arith.constant 0 : i32
    %c0_i32_0 = arith.constant 0 : i32
    return %arg1, %arg0, %c0_i32 : i32, i32, i32
  }
  func.func @transform_2(%arg0: i32, %arg1: i32) -> (i32, i32) {
    %c0_i32 = arith.constant 0 : i32
    %c0_i32_0 = arith.constant 0 : i32
    %c0_i32_1 = arith.constant 0 : i32
    return %c0_i32, %c0_i32_0 : i32, i32
  }
  func.func @transform_3(%arg0: i32, %arg1: i32) -> (i32, i32) {
    %c0_i32 = arith.constant 0 : i32
    %c0_i32_0 = arith.constant 0 : i32
    %c0_i32_1 = arith.constant 0 : i32
    return %c0_i32, %c0_i32_0 : i32, i32
  }
  func.func @transform_4(%arg0: i32, %arg1: i32) -> (i32, i32) {
    %c0_i32 = arith.constant 0 : i32
    %c0_i32_0 = arith.constant 0 : i32
    %c0_i32_1 = arith.constant 0 : i32
    return %c0_i32, %c0_i32_0 : i32, i32
  }
  func.func @transform_5(%arg0: i32, %arg1: i32) -> (i32, i32) {
    %c0_i32 = arith.constant 0 : i32
    %c0_i32_0 = arith.constant 0 : i32
    %c0_i32_1 = arith.constant 0 : i32
    return %c0_i32, %c0_i32_0 : i32, i32
  }
  func.func @transform_6(%arg0: i32, %arg1: i32) -> (i32, i32) {
    %c0_i32 = arith.constant 0 : i32
    %c0_i32_0 = arith.constant 0 : i32
    return %arg0, %c0_i32 : i32, i32
  }
}

</mosaic_0001>

<bundles_post_ra>
// kernel: tpu_custom_call.1
= control target key start
LH: loop header
LB: loop body
LE: loop exit
PB: predicated region body
PF: predicated region fallthrough
CT: control target
= control target key end

     0   :  { %11 = vsyncpa [#allocation5], 0  ;;  %s556_s0 = inlined_call_operand.hbm [shape: f32[2,8,32], index: 0, kind: input, shape index: {}]   ;;  %s557_s1 = inlined_call_operand.hbm [shape: f32[1,2,8], index: 1, kind: input, shape index: {}]   ;;  %s558_s2 = inlined_call_operand.hbm [shape: f32[32,32], index: 2, kind: input, shape index: {}]   ;;  %s559_s3 = inlined_call_operand.vmem [shape: f32[1,32], index: 3, kind: input, shape index: {}]   ;;  %s560_s4 = inlined_call_operand.hbm [shape: f32[32,128], index: 4, kind: input, shape index: {}]   ;;  %s561_s5 = inlined_call_operand.vmem [shape: f32[1,128], index: 5, kind: input, shape index: {}]   ;;  %s562_s6 = inlined_call_operand.hbm [shape: f32[2,128], index: 6, kind: output, shape index: {}]  }
   0x1   :  { %12 = vsyncpa [#allocation8], 0 }
   0x2   :  { %13 = vsyncpa [#allocation11], 0  ;;  %s33_s23 = sshll.u32 %s557_s1, 4  ;;  %s34_s23 = int_to_ptr.hbm [resolvable:$true] %s33_s23 }
   0x3   :  { %14 = vsyncpa [#allocation6], 0  ;;  %s480_s24 = smov [#allocation7]   ;;  %s19_s28 = sshll.u32 %s556_s0, 4  ;;  %s20_s28 = int_to_ptr.hbm [resolvable:$true] %s19_s28 }
   0x4   :  { %s35_s25 = sshll.u32 %s480_s24, 4  ;;  %s481_s29 = smov [#allocation4]   ;;  %s36_s25 = int_to_ptr.vmem [resolvable:$true] %s35_s25 }
   0x5   :  { %38 = dma.hbm_to_vmem [thread:$0]  %s34_s23, 32, %s36_s25, [#allocation8]  }
   0x6   :  { %s21_s30 = sshll.u32 %s481_s29, 4  ;;  %s482_s7 = smov 128   ;;  %s22_s30 = int_to_ptr.vmem [resolvable:$true] %s21_s30 }
   0x7   :  { %s483_s8 = smov 8   ;;  %s43_s1 = sshll.u32 %s558_s2, 4  ;;  %s44_s1 = int_to_ptr.hbm [resolvable:$true] %s43_s1 }
   0x8   :  { %27 = dma.hbm_to_vmem [thread:$0]  %s20_s28, 256, %s22_s30, [#allocation5], %s482_s7, %s482_s7, %s483_s8  }
   0x9   :  { %s484_s11 = smov [#allocation9]   ;;  %s58_s0 = sshll.u32 %s560_s4, 4  ;;  %s59_s0 = int_to_ptr.hbm [resolvable:$true] %s58_s0 }
   0xa   :  { %s45_s12 = sshll.u32 %s484_s11, 4  ;;  %s485_s15 = smov [#allocation10]   ;;  %s46_s12 = int_to_ptr.vmem [resolvable:$true] %s45_s12 }
   0xb   :  { %51 = dma.hbm_to_vmem [thread:$0]  %s44_s1, 512, %s46_s12, [#allocation8], %s482_s7, %s482_s7, %s483_s8  }
   0xc   :  { %s60_s16 = sshll.u32 %s485_s15, 4  ;;  %s61_s16 = int_to_ptr.vmem [resolvable:$true] %s60_s16 }
   0xd   :  { %66 = dma.hbm_to_vmem [thread:$0]  %s59_s0, 512, %s61_s16, [#allocation11], %s482_s7, %s482_s7, %s483_s8  }
   0xe   :  { %472 = dma.done.wait [#allocation5], 256  }
   0xf   :  { %473 = vsyncadd [#allocation5], 4294967040 }
  0x10   :  { %474 = dma.done.wait [#allocation8], 544  }
  0x11   :  { %475 = vsyncadd [#allocation8], 4294966752 }
  0x12   :  { %476 = dma.done.wait [#allocation11], 512  }
  0x13   :  { %477 = vsyncadd [#allocation11], 4294966784  ;;  %v98_v0 = vlaneseq  ;;  %vm89_vm0 = vcmask 254976   ;;  %vm91_vm1 = vcmask 1024   ;;  %v486_v1 = vmov 0.0   ;;  %v94_v11 = vld [vmem:[#allocation4 + $0x8] sm:$0xff] }
  0x14   :  { %90 = vst.msk [vmem:[#allocation2] sm:$0x3] %vm89_vm0, %v486_v1  ;;  %vm137_vm2 = vcmask 58368   ;;  %v95_v3 = vld [vmem:[#allocation7] sm:$0x3]  ;;  %v487_v7 = vmov 0  }
  0x15   :  { %v99_v2 = vshrl.u32 %v98_v0, 7  ;;  %92 = vst.msk [vmem:[#allocation3] sm:$0x3] %vm91_vm1, %v486_v1  ;;  %v138_v4 = vsel %vm137_vm2, %v95_v3, 0.0  ;;  %v104_v5 = vperm.slane %v95_v3, 1  ;;  %v97_v6 = vperm.slane %v95_v3, 0 }
  0x16   :  { %139 = vadd.xlane.f32.xlu0 %v138_v4  ;;  %vm113_vm3 = vcmask 261120   ;;  %v173_v14 = vld [vmem:[#allocation9 + $0x18] sm:$0xff]  ;;  %v172_v15 = vld [vmem:[#allocation9 + $0x10] sm:$0xff]  ;;  %v171_v17 = vld [vmem:[#allocation9 + $0x8] sm:$0xff]  ;;  %vm130_vm8 = vcmask 1041409   ;;  %v488_v57 = vmov 32.0  }
  0x17   :  { %339 = vset.pattern.permute.xlu1 %v99_v2  ;;  %338 = vset.pattern.permute.xlu0 %v99_v2  ;;  %v93_v22 = vld [vmem:[#allocation4] sm:$0xff]  ;;  %v170_v49 = vld [vmem:[#allocation9] sm:$0xff]  ;;  %v342_v53 = vld [vmem:[%s559_s3] ss:$0 sm:$0xff]  ;;  %s489_s18 = smov [#allocation12]   ;;  %s313_s22 = sshll.u32 %s562_s6, 4  ;;  %s314_s22 = int_to_ptr.hbm [resolvable:$true] %s313_s22 }
  0x18   :  { %193 = vmatpush.msra.mxu0 %v173_v14  ;;  %s311_s19 = sshll.u32 %s489_s18, 4  ;;  %s312_s19 = int_to_ptr.vmem [resolvable:$true] %s311_s19 }
  0x1a   :  { %194 = vmatpush.msra.mxu0 %v172_v15 }
  0x1b   :  { %v96_v45 = vld [vmem:[#allocation2] sm:$0x3] }
  0x1c   :  { %v136_v8 = vld [vmem:[#allocation3] sm:$0x3]  ;;  %195 = vmatpush.msra.mxu0 %v171_v17 }
  0x1e   :  { %196 = vmatpush.msra.mxu0 %v170_v49 }
  0x1f   :  { %109 = vperm.xlu1 %339, %v104_v5   ;;  %v277_v5 = vld [vmem:[#allocation10 + $0x18] sm:$0xff] }
  0x20   :  { %297 = vmatpush.msra.mxu1 %v277_v5 }
  0x27   :  { %340 = vset.pattern.permute.xlu1 %v487_v7 }
  0x2a   :  { %102 = vperm.xlu0 %338, %v97_v6   ;;  %v276_v6 = vld [vmem:[#allocation10 + $0x10] sm:$0xff] }
  0x2b   :  { %298 = vmatpush.msra.mxu1 %v276_v6 }
  0x32   :  { %341 = vset.pattern.permute.xlu0 %v487_v7  ;;  %v275_v7 = vld [vmem:[#allocation10 + $0x8] sm:$0xff] }
  0x33   :  { %299 = vmatpush.msra.mxu1 %v275_v7 }
  0x89   :  { %v140_v9 = vpop.xlane.xlu0 %139 }
  0x8a   :  { %v141_v10 = vadd.f32 %v140_v9, %v136_v8  ;;  %v274_v8 = vld [vmem:[#allocation10] sm:$0xff] }
  0x8b   :  { %300 = vmatpush.msra.mxu1 %v274_v8 }
  0x8c   :  { %143 = vst.msk [vmem:[#allocation3] sm:$0x3] %vm91_vm1, %v141_v10 }
  0x91   :  { %v110_v12 = vpop.permute.xlu1 %109 }
  0x92   :  { %v112_v13 = vmul.f32 %v110_v12, %v94_v11 }
  0x93   :  { %v147_v18 = vld [vmem:[#allocation3] sm:$0x3] }
  0x94   :  { %v121_v16 = vsel %vm113_vm3, %v112_v13, 0.0  ;;  %v148_v19 = vmax.f32 %v147_v18, 1e-09 }
  0x95   :  { %v122_v20 = vrot.slane %v121_v16, 4 }
  0x96   :  { %344 = vrcp.f32 %v148_v19  ;;  %v161_v30 = vand.u32 2147483648, %v148_v19  ;;  %v159_v34 = vand.u32 2147483647, %v148_v19  ;;  %vm155_vm5 = vweird.f32 %v148_v19 }
  0x97   :  { %v123_v21 = vadd.f32 %v122_v20, %v121_v16  ;;  %346 = vrcp.f32 %v488_v57 }
  0x98   :  { %v162_v37 = vor.u32 1.1754944e-38, %v161_v30  ;;  %vm160_vm7 = vcmp.eq.f32.partialorder %v159_v34, 8.507059e+37 }
  0x99   :  { %v124_v24 = vrot.slane %v123_v21, 2 }
  0x9b   :  { %v125_v31 = vadd.f32 %v124_v24, %v123_v21 }
  0x9c   :  { %v345_v23 = vpop.eup %344  ;;  %v103_v25 = vpop.permute.xlu0 %102 }
  0x9d   :  { %v151_v26 = vmul.f32 %v345_v23, %v148_v19  ;;  %v111_v27 = vmul.f32 %v103_v25, %v93_v22  ;;  %vm156_vm4 = vweird.f32 %v345_v23  ;;  %v126_v38 = vrot.slane %v125_v31, 1  ;;  %v347_v58 = vpop.eup %346 }
  0x9e   :  { %vm157_vm6 = vmor %vm155_vm5, %vm156_vm4  ;;  %v205_v59 = vmul.f32 32.0, %v347_v58  ;;  %vm209_vm9 = vweird.f32 %v347_v58 }
  0x9f   :  { %v152_v28 = vsub.f32 1.0, %v151_v26  ;;  %v114_v29 = vsel %vm113_vm3, %v111_v27, 0.0  ;;  %v127_v43 = vadd.f32 %v126_v38, %v125_v31 }
  0xa0   :  { %v115_v32 = vrot.slane %v114_v29, 4  ;;  %v206_v60 = vsub.f32 1.0, %v205_v59  ;;  %v343_v59 = vld [vmem:[%s561_s5] ss:$0 sm:$0xff] }
  0xa1   :  { %v153_v33 = vmul.f32 %v345_v23, %v152_v28 }
  0xa2   :  { %v116_v35 = vadd.f32 %v115_v32, %v114_v29  ;;  %v207_v61 = vmul.f32 %v347_v58, %v206_v60 }
  0xa3   :  { %v154_v36 = vadd.f32 %v345_v23, %v153_v33 }
  0xa4   :  { %v117_v39 = vrot.slane %v116_v35, 2  ;;  %v208_v62 = vadd.f32 %v347_v58, %v207_v61 }
  0xa5   :  { %v158_v40 = vsel %vm157_vm6, %v345_v23, %v154_v36 }
  0xa6   :  { %v163_v41 = vsel %vm160_vm7, %v162_v37, %v158_v40  ;;  %v118_v42 = vadd.f32 %v117_v39, %v116_v35  ;;  %v210_v63 = vsel %vm209_vm9, %v347_v58, %v208_v62 }
  0xa7   :  { %166 = vperm.xlu1 %340, %v163_v41  }
  0xa8   :  { %v119_v44 = vrot.slane %v118_v42, 1 }
  0xaa   :  { %v120_v46 = vadd.f32 %v119_v44, %v118_v42 }
  0xac   :  { %v131_v47 = vsel %vm130_vm8, %v127_v43, %v120_v46 }
  0xad   :  { %v133_v48 = vadd.f32 %v131_v47, %v96_v45 }
  0xaf   :  { %135 = vst.msk [vmem:[#allocation2] sm:$0x3] %vm89_vm0, %v133_v48 }
  0xb6   :  { %v149_v51 = vld [vmem:[#allocation2] sm:$0x3] }
 0x119   :  { %v167_v50 = vpop.permute.xlu1 %166 }
 0x11a   :  { %v169_v52 = vmul.f32 %v167_v50, %v149_v51 }
 0x11c   :  { %325 = vmatmul.msk.f32.vlgmr.msra.gmra.mxu0 %vm113_vm3, %v169_v52 }
 0x199   :  { %v198_v54 = vpop.f32.mrf.mxu0 }
 0x19a   :  { %v199_v55 = vadd.f32 %v342_v53, %v198_v54 }
 0x19c   :  { %v201_v56 = vsel %vm89_vm0, %v199_v55, 0.0 }
 0x19d   :  { %202 = vadd.xlane.f32.xlu2 %v201_v56 }
 0x210   :  { %v203_v0 = vpop.xlane.xlu2 %202 }
 0x211   :  { %v211_v1 = vmul.f32 %v210_v63, %v203_v0 }
 0x213   :  { %v212_v2 = vsub.f32 %v199_v55, %v211_v1 }
 0x215   :  { %v213_v3 = vmul.f32 %v212_v2, %v212_v2 }
 0x217   :  { %v214_v4 = vsel %vm89_vm0, %v213_v3, 0.0 }
 0x218   :  { %215 = vadd.xlane.f32.xlu2 %v214_v4 }
 0x28b   :  { %v216_v9 = vpop.xlane.xlu2 %215 }
 0x28c   :  { %v217_v10 = vmul.f32 %v216_v9, %v210_v63 }
 0x28e   :  { %v218_v11 = vadd.f32 1e-05, %v217_v10 }
 0x290   :  { %348 = vrsqrt.f32 %v218_v11  ;;  %vm225_vm11 = vweird.f32 %v218_v11 }
 0x296   :  { %v349_v12 = vpop.eup %348 }
 0x297   :  { %v220_v13 = vmul.f32 %v349_v12, %v218_v11  ;;  %vm226_vm10 = vweird.f32 %v349_v12 }
 0x298   :  { %vm227_vm12 = vmor %vm225_vm11, %vm226_vm10 }
 0x299   :  { %v221_v14 = vmul.f32 %v349_v12, %v220_v13 }
 0x29b   :  { %v222_v15 = vmul.f32 0.5, %v221_v14 }
 0x29d   :  { %v223_v16 = vsub.f32 1.5, %v222_v15 }
 0x29f   :  { %v224_v17 = vmul.f32 %v349_v12, %v223_v16 }
 0x2a1   :  { %v228_v18 = vsel %vm227_vm12, %v349_v12, %v224_v17 }
 0x2a2   :  { %v229_v19 = vmul.f32 %v228_v18, %v212_v2 }
 0x2a4   :  { %v231_v20 = vmul.f32 0.70710677, %v229_v19  ;;  %v230_v56 = vmul.f32 0.5, %v229_v19 }
 0x2a6   :  { %v232_v21 = vmul.f32 %v231_v20, %v231_v20 }
 0x2a8   :  { %v233_v22 = vmin.f32 %v232_v21, 16.0 }
 0x2aa   :  { %v234_v23 = vmul.f32 2.1237322e-06, %v233_v22  ;;  %v245_v24 = vmul.f32 3.8918573e-05, %v233_v22 }
 0x2ac   :  { %v235_v25 = vadd.f32 0.00028619796, %v234_v23  ;;  %v246_v26 = vadd.f32 0.001143296, %v245_v24 }
 0x2ae   :  { %v236_v27 = vmul.f32 %v235_v25, %v233_v22  ;;  %v247_v28 = vmul.f32 %v246_v26, %v233_v22 }
 0x2b0   :  { %v248_v29 = vadd.f32 0.014752088, %v247_v28  ;;  %v237_v30 = vadd.f32 0.0036580483, %v236_v27 }
 0x2b2   :  { %v249_v31 = vmul.f32 %v248_v29, %v233_v22  ;;  %v238_v33 = vmul.f32 %v237_v30, %v233_v22 }
 0x2b4   :  { %v250_v32 = vadd.f32 0.112945676, %v249_v31  ;;  %v239_v36 = vadd.f32 0.05243302, %v238_v33 }
 0x2b6   :  { %v251_v34 = vmul.f32 %v250_v32, %v233_v22  ;;  %v240_v39 = vmul.f32 %v239_v36, %v233_v22 }
 0x2b8   :  { %v252_v35 = vadd.f32 0.4994258, %v251_v34  ;;  %v241_v40 = vadd.f32 0.18741608, %v240_v39 }
 0x2ba   :  { %v253_v37 = vmul.f32 %v252_v35, %v233_v22  ;;  %v242_v42 = vmul.f32 %v241_v40, %v233_v22 }
 0x2bc   :  { %v254_v38 = vadd.f32 1.0, %v253_v37  ;;  %v243_v46 = vadd.f32 1.1283791, %v242_v42 }
 0x2be   :  { %350 = vrcp.f32 %v254_v38  ;;  %v266_v45 = vand.u32 2147483648, %v254_v38  ;;  %v264_v48 = vand.u32 2147483647, %v254_v38  ;;  %vm260_vm14 = vweird.f32 %v254_v38 }
 0x2bf   :  { %v244_v51 = vmul.f32 %v243_v46, %v231_v20 }
 0x2c0   :  { %v267_v50 = vor.u32 1.1754944e-38, %v266_v45  ;;  %vm265_vm0 = vcmp.eq.f32.partialorder %v264_v48, 8.507059e+37 }
 0x2c4   :  { %v351_v41 = vpop.eup %350 }
 0x2c5   :  { %v256_v43 = vmul.f32 %v351_v41, %v254_v38  ;;  %vm261_vm13 = vweird.f32 %v351_v41 }
 0x2c6   :  { %vm262_vm15 = vmor %vm260_vm14, %vm261_vm13 }
 0x2c7   :  { %v257_v44 = vsub.f32 1.0, %v256_v43 }
 0x2c9   :  { %v258_v47 = vmul.f32 %v351_v41, %v257_v44 }
 0x2cb   :  { %v259_v49 = vadd.f32 %v351_v41, %v258_v47 }
 0x2cd   :  { %v263_v52 = vsel %vm262_vm15, %v351_v41, %v259_v49 }
 0x2ce   :  { %v268_v53 = vsel %vm265_vm0, %v267_v50, %v263_v52 }
 0x2cf   :  { %v269_v54 = vmul.f32 %v268_v53, %v244_v51 }
 0x2d1   :  { %v326_v55 = vclamps-f32 %v269_v54, 1.0 }
 0x2d3   :  { %v272_v57 = vadd.f32 1.0, %v326_v55 }
 0x2d5   :  { %v273_v58 = vmul.f32 %v272_v57, %v230_v56 }
 0x2d7   :  { %327 = vmatmul.msk.f32.vlgmr.msra.gmra.mxu1 %vm113_vm3, %v273_v58 }
 0x354   :  { %v302_v60 = vpop.f32.mrf.mxu1 }
 0x355   :  { %v303_v61 = vadd.f32 %v343_v59, %v302_v60 }
 0x357   :  { %305 = vst [vmem:[#allocation12] sm:$0x3] %v303_v61 }
 0x358   :  { %316 = dma.vmem_to_hbm [thread:$0]  %s312_s19, 32, %s314_s22, [#allocation6]  }
 0x359   :  { %478 = dma.done.wait [#allocation6], 32  }
 0x35a   :  { %479 = vsyncadd [#allocation6], 4294967264 }
 0x35b   :  { %321 = vsyncpa [#allocation5], 1 }
 0x35c   :  { %322 = vsyncpa [#allocation8], 1 }
 0x35d   :  { %323 = vsyncpa [#allocation11], 1 }
 0x35e   :  { %324 = vsyncpa [#allocation6], 1 }

</bundles_post_ra>
